<compile_context>
chip_gen: v5e
topology: v5e:2x2
jax: 0.10.0
libtpu: 0.0.40
codegen_flags: <defaults>
</compile_context>

<pallas_src>
import jax
import jax.numpy as jnp
from jax.experimental import pallas as pl
from jax.experimental.pallas import tpu as pltpu


def _abs_inv_sim_kernel(k_ref, x_ref, o_ref):
    # k_ref: f32 scalar in SMEM, shape (1,); x_ref / o_ref: lane-dense VMEM tiles.
    k = k_ref[0]
    x = x_ref[...].astype(jnp.float32)
    y = pl.reciprocal(1.0 + k * jnp.abs(x), approx=False)  # exact divide via EUP slot
    o_ref[...] = y.astype(o_ref.dtype)


_LANE = 128
_TARGET_BLOCK_BYTES = 2 * 1024 * 1024  # ~2 MiB per block -> ~85% of HBM roofline,
                                        # small enough for v7x's 64 MiB VMEM with
                                        # double-buffered in+out (<= ~8-16 MiB resident).


def _choose_layout(total: int, itemsize: int):
    """Pick (width, pad, rows, tile_rows) for a lane-dense (rows, width) slab."""
    # Widest lane-dense width (multiple of 128) that divides the flat length.
    for w in (4096, 2048, 1024, 512, 256, 128):
        if total % w == 0:
            width, pad = w, 0
            break
    else:
        width = _LANE
        pad = (-total) % _LANE  # only a <128-element pad, never a full-tile pad
    rows = (total + pad) // width
    # Rows per block: aim for ~_TARGET_BLOCK_BYTES; multiple of 32 covers
    # f32/bf16/int8 sublane tiling.  Use the full row extent if it is smaller
    # (a full-extent block dim is always legal).
    tr = max(32, (_TARGET_BLOCK_BYTES // (width * itemsize)) // 32 * 32)
    tile_rows = rows if rows <= tr else tr
    return width, pad, rows, tile_rows


@jax.jit
def absolute_inverse_similarity(x: jax.Array, k: jax.Array) -> jax.Array:
    """y = 1 / (1 + k * |x|), elementwise; k is the scalar parameter (shape (1,))."""
    orig_shape = x.shape
    orig_dtype = x.dtype
    total = x.size

    width, pad, rows, tile_rows = _choose_layout(total, x.dtype.itemsize)

    x_flat = x.reshape(-1)
    if pad:
        # Only triggered when total is not a multiple of 128; padded lanes
        # produce 1.0 and are sliced off below.
        x_flat = jnp.pad(x_flat, (0, pad))
    x2d = x_flat.reshape(rows, width)

    grid = (pl.cdiv(rows, tile_rows),)

    out2d = pl.pallas_call(
        _abs_inv_sim_kernel,
        out_shape=jax.ShapeDtypeStruct((rows, width), orig_dtype),
        grid_spec=pl.GridSpec(
            grid=grid,
            in_specs=[
                pl.BlockSpec(memory_space=pltpu.MemorySpace.SMEM),   # k (f32 scalar)
                pl.BlockSpec((tile_rows, width), lambda i: (i, 0)),  # x tile
            ],
            out_specs=pl.BlockSpec((tile_rows, width), lambda i: (i, 0)),
        ),
        compiler_params=pltpu.CompilerParams(
            dimension_semantics=("parallel",),       # shard grid steps across TCs (v7x megacore)
            vmem_limit_bytes=32 * 1024 * 1024,       # explicit; plenty for 2 MiB blocks on v5e/v6e/v7x
        ),
    )(k.astype(jnp.float32), x2d)

    out_flat = out2d.reshape(-1)
    if pad:
        out_flat = out_flat[:total]
    return out_flat.reshape(orig_shape)


if __name__ == "__main__":
    key = jax.random.PRNGKey(0)
    # Small NCHW-like input consistent with the module's elementwise forward.
    x = jax.random.normal(key, (2, 4, 16, 16), dtype=jnp.float32)

    # Deterministic parameter init (starting_value=None -> k = 1.0), shape (1,)
    k = jnp.array([1.0], dtype=jnp.float32)

    y = absolute_inverse_similarity(x, k)
    y = jax.block_until_ready(y)

    # Reference check in plain JAX
    y_ref = 1.0 / (1.0 + k[0] * jnp.abs(x))
    assert y.shape == x.shape and y.dtype == x.dtype
    assert jnp.allclose(y, y_ref, atol=1e-6, rtol=1e-6)

    print("KERNEL_OK")
</pallas_src>

<mosaic_0001>
module attributes {stable_mosaic.version = 11 : i64} {
  func.func @_abs_inv_sim_kernel(%arg0: i32, %arg1: memref<1xf32, #tpu.memory_space<smem>>, %arg2: memref<1x2048xf32, #tpu.memory_space<vmem>>, %arg3: memref<1x2048xf32, #tpu.memory_space<vmem>>) attributes {dimension_semantics = [#tpu.dimension_semantics<parallel>], iteration_bounds = array<i64: 1>, scalar_prefetch = 0 : i64, scratch_operands = 0 : i64, tpu.core_type = #tpu.core_type<tc>, window_params = [{transform_indices = @transform_0, window_bounds = array<i64: 1>}, {transform_indices = @transform_1, window_bounds = array<i64: 1, 2048>}, {transform_indices = @transform_2, window_bounds = array<i64: 1, 2048>}]} {
    %c0 = arith.constant 0 : index
    %0 = memref.load %arg1[%c0] : memref<1xf32, #tpu.memory_space<smem>>
    %c0_0 = arith.constant 0 : index
    %c0_1 = arith.constant 0 : index
    %1 = vector.load %arg2[%c0_0, %c0_1] : memref<1x2048xf32, #tpu.memory_space<vmem>>, vector<1x2048xf32>
    %2 = math.absf %1 : vector<1x2048xf32>
    %3 = vector.broadcast %0 : f32 to vector<1x2048xf32>
    %4 = arith.mulf %3, %2 : vector<1x2048xf32>
    %cst = arith.constant 1.000000e+00 : f32
    %5 = vector.broadcast %cst : f32 to vector<1x2048xf32>
    %6 = arith.addf %5, %4 : vector<1x2048xf32>
    %7 = tpu.reciprocal %6 : vector<1x2048xf32> -> vector<1x2048xf32>
    %c0_2 = arith.constant 0 : index
    %c0_3 = arith.constant 0 : index
    %8 = vector.load %arg3[%c0_2, %c0_3] : memref<1x2048xf32, #tpu.memory_space<vmem>>, vector<1x2048xf32>
    tpu.vector_store %arg3[%c0_2, %c0_3], %7 {strides = array<i32>} : memref<1x2048xf32, #tpu.memory_space<vmem>>, vector<1x2048xf32>,
    return
  }
  func.func @transform_0(%arg0: i32) -> i32 {
    %c0_i32 = arith.constant 0 : i32
    %c0_i32_0 = arith.constant 0 : i32
    return %c0_i32 : i32
  }
  func.func @transform_1(%arg0: i32) -> (i32, i32) {
    %c0_i32 = arith.constant 0 : i32
    %c0_i32_0 = arith.constant 0 : i32
    return %arg0, %c0_i32 : i32, i32
  }
  func.func @transform_2(%arg0: i32) -> (i32, i32) {
    %c0_i32 = arith.constant 0 : i32
    %c0_i32_0 = arith.constant 0 : i32
    return %arg0, %c0_i32 : i32, i32
  }
}

</mosaic_0001>

<bundles_post_ra>
// kernel: absolute_inverse_similarity.1
= control target key start
LH: loop header
LB: loop body
LE: loop exit
PB: predicated region body
PF: predicated region fallthrough
CT: control target
= control target key end

     0   :  { %s90_s0 = inlined_call_operand.<no memory space> [shape: f32[1], index: 0, kind: input, shape index: {}]   ;;  %s91_s1 = inlined_call_operand.vmem [shape: f32[1,2048], index: 1, kind: input, shape index: {}]   ;;  %s92_s2 = inlined_call_operand.vmem [shape: f32[1,2048], index: 2, kind: output, shape index: {}]  }
   0x1   :  { %v13_v0 = vld [vmem:[%s91_s1] sm:$0xff]  ;;  %v17_v1 = vstv %s90_s0  ;;  %v14_v2 = vld [vmem:[%s91_s1 + $0x8] sm:$0xff] }
   0x2   :  { %v15_v3 = vand.u32 2147483647, %v13_v0  ;;  %v16_v4 = vand.u32 2147483647, %v14_v2 }
   0x4   :  { %v18_v5 = vmul.f32 %v17_v1, %v15_v3  ;;  %v19_v6 = vmul.f32 %v17_v1, %v16_v4 }
   0x6   :  { %v20_v7 = vadd.f32 1.0, %v18_v5  ;;  %v21_v8 = vadd.f32 1.0, %v19_v6 }
   0x8   :  { %56 = vrcp.f32 %v20_v7  ;;  %vm27_vm0 = vweird.f32 %v20_v7  ;;  %v33_v12 = vand.u32 2147483648, %v20_v7  ;;  %v31_v15 = vand.u32 2147483647, %v20_v7 }
   0x9   :  { %58 = vrcp.f32 %v21_v8  ;;  %v47_v16 = vand.u32 2147483648, %v21_v8  ;;  %vm41_vm2 = vweird.f32 %v21_v8  ;;  %v45_v18 = vand.u32 2147483647, %v21_v8 }
   0xa   :  { %v34_v20 = vor.u32 1.1754944e-38, %v33_v12  ;;  %vm32_vm5 = vcmp.eq.f32.partialorder %v31_v15, 8.507059e+37 }
   0xb   :  { %v48_v23 = vor.u32 1.1754944e-38, %v47_v16  ;;  %vm46_vm7 = vcmp.eq.f32.partialorder %v45_v18, 8.507059e+37 }
   0xe   :  { %v57_v9 = vpop.eup %56 }
   0xf   :  { %v59_v10 = vpop.eup %58  ;;  %v23_v11 = vmul.f32 %v57_v9, %v20_v7  ;;  %vm28_vm1 = vweird.f32 %v57_v9 }
  0x10   :  { %v37_v13 = vmul.f32 %v59_v10, %v21_v8  ;;  %vm42_vm3 = vweird.f32 %v59_v10  ;;  %vm29_vm4 = vmor %vm27_vm0, %vm28_vm1 }
  0x11   :  { %v24_v14 = vsub.f32 1.0, %v23_v11  ;;  %vm43_vm6 = vmor %vm41_vm2, %vm42_vm3 }
  0x12   :  { %v38_v17 = vsub.f32 1.0, %v37_v13 }
  0x13   :  { %v25_v19 = vmul.f32 %v57_v9, %v24_v14 }
  0x14   :  { %v39_v21 = vmul.f32 %v59_v10, %v38_v17 }
  0x15   :  { %v26_v22 = vadd.f32 %v57_v9, %v25_v19 }
  0x16   :  { %v40_v24 = vadd.f32 %v59_v10, %v39_v21 }
  0x17   :  { %v30_v25 = vsel %vm29_vm4, %v57_v9, %v26_v22 }
  0x18   :  { %v35_v26 = vsel %vm32_vm5, %v34_v20, %v30_v25  ;;  %v44_v27 = vsel %vm43_vm6, %v59_v10, %v40_v24 }
  0x19   :  { %50 = vst [vmem:[%s92_s2] sm:$0xff] %v35_v26  ;;  %v49_v28 = vsel %vm46_vm7, %v48_v23, %v44_v27 }
  0x1a   :  { %51 = vst [vmem:[%s92_s2 + $0x8] sm:$0xff] %v49_v28 }

</bundles_post_ra>
